<compile_context>
chip_gen: v5e
topology: v5e:2x2
jax: 0.10.0
libtpu: 0.0.40
codegen_flags: <defaults>
</compile_context>

<pallas_src>
import functools

import jax
import jax.numpy as jnp
from jax.experimental import pallas as pl
from jax.experimental.pallas import tpu as pltpu


def _round_up(x, m):
    return (x + m - 1) // m * m


def mpo_actor_kernel(state_ref, w1_ref, b1_ref, w2_ref, b2_ref, w3_ref, b3_ref,
                     whead_ref, bhead_ref, eps_ref, out_ref, *, action_dim, sample):
    # Matmul operands in bf16 (MXU-native), accumulation + elementwise in f32.
    x = state_ref[...].astype(jnp.bfloat16)

    h = jnp.dot(x, w1_ref[...], preferred_element_type=jnp.float32) + b1_ref[...]
    h = jnp.maximum(h, 0.0).astype(jnp.bfloat16)

    h = jnp.dot(h, w2_ref[...], preferred_element_type=jnp.float32) + b2_ref[...]
    h = jnp.maximum(h, 0.0).astype(jnp.bfloat16)

    h = jnp.dot(h, w3_ref[...], preferred_element_type=jnp.float32) + b3_ref[...]
    h = jnp.maximum(h, 0.0).astype(jnp.bfloat16)

    # Fused mu/cho head: one (H, 2A) matmul instead of two (H, A) matmuls.
    head = jnp.dot(h, whead_ref[...], preferred_element_type=jnp.float32) + bhead_ref[...]
    mu = head[:, :action_dim]
    cho = jnp.exp(head[:, action_dim:])

    if sample:
        # MultivariateNormal(mu, scale_tril=diag(cho)).rsample() == mu + cho*eps
        action = mu + cho * eps_ref[...]
    else:
        action = mu  # deterministic branch: tanh(mu) is written directly

    # Single lane-dense output slab: [ tanh(action) | mu | cho ]
    out_ref[...] = jnp.concatenate([jnp.tanh(action), mu, cho], axis=-1)


def mpo_actor_forward(state, params, eps=None, *, sample=True, block_b=256):
    """Run the MPOActor forward pass. Returns (tanh(action), (mu, cho_tril))."""
    B, S = state.shape
    A = params["bhead"].shape[1] // 2

    if eps is None:
        eps = jnp.zeros((B, A), dtype=jnp.float32)

    # Batch tile: large enough to amortize per-step overhead, small enough to
    # stay comfortably in VMEM; tiny batches just get one (padded) tile.
    TB = min(block_b, _round_up(B, 8))
    Bp = _round_up(B, TB)
    if Bp != B:
        state = jnp.pad(state, ((0, Bp - B), (0, 0)))
        eps = jnp.pad(eps, ((0, Bp - B), (0, 0)))

    grid = (Bp // TB,)

    def batch_spec(cols):
        return pl.BlockSpec((TB, cols), lambda i: (i, 0))

    def resident_spec(arr):
        # Full-array block, constant index -> stays VMEM-resident across the grid.
        return pl.BlockSpec(arr.shape, lambda i: (0, 0))

    args = (state,
            params["w1"], params["b1"],
            params["w2"], params["b2"],
            params["w3"], params["b3"],
            params["whead"], params["bhead"],
            eps)

    in_specs = ([batch_spec(S)]
                + [resident_spec(a) for a in args[1:-1]]
                + [batch_spec(A)])

    kernel = functools.partial(mpo_actor_kernel, action_dim=A, sample=sample)

    out = pl.pallas_call(
        kernel,
        out_shape=jax.ShapeDtypeStruct((Bp, 3 * A), jnp.float32),
        grid=grid,
        in_specs=in_specs,
        out_specs=pl.BlockSpec((TB, 3 * A), lambda i: (i, 0)),
        compiler_params=pltpu.CompilerParams(
            dimension_semantics=("parallel",)),  # v7x: shard batch tiles over both TCs
    )(*args)

    out = out[:B]
    act_tanh = out[:, :A]
    mu = out[:, A:2 * A]
    cho_diag = out[:, 2 * A:]

    # diag_embed of the exp'd cholesky diagonal (glue, not hot path).
    cho_tril = cho_diag[..., None] * jnp.eye(A, dtype=cho_diag.dtype)[None, :, :]
    return act_tanh, (mu, cho_tril)


# ---------------------------------------------------------------------------
# Parameter construction (mirrors torch xavier_normal_ weights + default bias)
# ---------------------------------------------------------------------------
def xavier_normal(key, fan_in, fan_out):
    std = jnp.sqrt(2.0 / (fan_in + fan_out))
    return jax.random.normal(key, (fan_in, fan_out), dtype=jnp.float32) * std


def linear_bias(key, fan_in, fan_out):
    # PyTorch Linear default bias init: U(-1/sqrt(fan_in), 1/sqrt(fan_in))
    bound = 1.0 / jnp.sqrt(float(fan_in))
    return jax.random.uniform(key, (1, fan_out), minval=-bound, maxval=bound,
                              dtype=jnp.float32)


def make_params(key, state_dim, input_layer, actor_hidden, action_dim):
    ks = jax.random.split(key, 10)
    raw = {
        "w1": xavier_normal(ks[0], state_dim, input_layer),
        "b1": linear_bias(ks[1], state_dim, input_layer),
        "w2": xavier_normal(ks[2], input_layer, actor_hidden),
        "b2": linear_bias(ks[3], input_layer, actor_hidden),
        "w3": xavier_normal(ks[4], actor_hidden, actor_hidden),
        "b3": linear_bias(ks[5], actor_hidden, actor_hidden),
        "wmu": xavier_normal(ks[6], actor_hidden, action_dim),
        "bmu": linear_bias(ks[7], actor_hidden, action_dim),
        "wcho": xavier_normal(ks[8], actor_hidden, action_dim),
        "bcho": linear_bias(ks[9], actor_hidden, action_dim),
    }
    # Pack for the kernel: fuse mu/cho head into one (H, 2A) matmul and cast
    # matmul weights to bf16 (MXU-native); biases stay f32.
    return {
        "w1": raw["w1"].astype(jnp.bfloat16), "b1": raw["b1"],
        "w2": raw["w2"].astype(jnp.bfloat16), "b2": raw["b2"],
        "w3": raw["w3"].astype(jnp.bfloat16), "b3": raw["b3"],
        "whead": jnp.concatenate([raw["wmu"], raw["wcho"]], axis=1).astype(jnp.bfloat16),
        "bhead": jnp.concatenate([raw["bmu"], raw["bcho"]], axis=1),
    }


def reference_forward(state, params, eps, sample=True):
    """Pure-JAX reference with the same bf16 matmul / f32 elementwise scheme."""
    A = params["bhead"].shape[1] // 2
    h = state.astype(jnp.bfloat16)
    for w, b in (("w1", "b1"), ("w2", "b2"), ("w3", "b3")):
        h = jnp.dot(h, params[w], preferred_element_type=jnp.float32) + params[b]
        h = jnp.maximum(h, 0.0).astype(jnp.bfloat16)
    head = jnp.dot(h, params["whead"], preferred_element_type=jnp.float32) + params["bhead"]
    mu = head[:, :A]
    cho = jnp.exp(head[:, A:])
    action = mu + cho * eps if sample else mu
    return jnp.tanh(action), mu, cho


if __name__ == "__main__":
    # Small shapes consistent with the module: vector state (len(state_size)!=3)
    # -> Linear path.  state_size=(16,), INPUT_LAYER=32, ACTOR_HIDDEN=32,
    # action_size=(8,), batch=8.
    B, S, INPUT_LAYER, ACTOR_HIDDEN, A = 8, 16, 32, 32, 8

    key = jax.random.PRNGKey(0)
    k_params, k_state, k_eps = jax.random.split(key, 3)

    params = make_params(k_params, S, INPUT_LAYER, ACTOR_HIDDEN, A)
    state = jax.random.normal(k_state, (B, S), dtype=jnp.float32)
    # reparameterization noise for rsample() (deterministic here)
    eps = jax.random.normal(k_eps, (B, A), dtype=jnp.float32)

    fwd = jax.jit(functools.partial(mpo_actor_forward, sample=True))
    action, (mu, cho_tril) = fwd(state, params, eps)
    jax.block_until_ready((action, mu, cho_tril))

    assert action.shape == (B, A)
    assert mu.shape == (B, A)
    assert cho_tril.shape == (B, A, A)

    # Numerical sanity check against a pure-JAX reference (same bf16 scheme).
    ref_act, ref_mu, ref_cho = reference_forward(state, params, eps, sample=True)
    assert jnp.allclose(action, ref_act, atol=1e-3, rtol=1e-3)
    assert jnp.allclose(mu, ref_mu, atol=1e-3, rtol=1e-3)
    assert jnp.allclose(jnp.diagonal(cho_tril, axis1=-2, axis2=-1), ref_cho,
                        atol=1e-3, rtol=1e-3)

    # Deterministic branch (sample=False): tanh(mu) comes out of the kernel directly.
    det_fwd = jax.jit(functools.partial(mpo_actor_forward, sample=False))
    det_action, (det_mu, _) = det_fwd(state, params)
    jax.block_until_ready((det_action, det_mu))
    assert jnp.allclose(det_action, jnp.tanh(det_mu), atol=1e-6)

    # TODO(synk): Conv branch (len(state_size) == 3) of layer1 is not exercised
    # for vector observations and is not implemented here.
    print("KERNEL_OK")
</pallas_src>

<mosaic_0001>
module attributes {stable_mosaic.version = 11 : i64} {
  func.func @mpo_actor_kernel(%arg0: i32, %arg1: memref<8x16xf32, #tpu.memory_space<vmem>>, %arg2: memref<16x32xbf16, #tpu.memory_space<vmem>>, %arg3: memref<1x32xf32, #tpu.memory_space<vmem>>, %arg4: memref<32x32xbf16, #tpu.memory_space<vmem>>, %arg5: memref<1x32xf32, #tpu.memory_space<vmem>>, %arg6: memref<32x32xbf16, #tpu.memory_space<vmem>>, %arg7: memref<1x32xf32, #tpu.memory_space<vmem>>, %arg8: memref<32x16xbf16, #tpu.memory_space<vmem>>, %arg9: memref<1x16xf32, #tpu.memory_space<vmem>>, %arg10: memref<8x8xf32, #tpu.memory_space<vmem>>, %arg11: memref<8x24xf32, #tpu.memory_space<vmem>>) attributes {dimension_semantics = [#tpu.dimension_semantics<parallel>], iteration_bounds = array<i64: 1>, scalar_prefetch = 0 : i64, scratch_operands = 0 : i64, tpu.core_type = #tpu.core_type<tc>, window_params = [{transform_indices = @transform_0, window_bounds = array<i64: 8, 16>}, {pipeline_mode = #tpu.pipeline_mode<synchronous>, transform_indices = @transform_1, window_bounds = array<i64: 16, 32>}, {pipeline_mode = #tpu.pipeline_mode<synchronous>, transform_indices = @transform_2, window_bounds = array<i64: 1, 32>}, {pipeline_mode = #tpu.pipeline_mode<synchronous>, transform_indices = @transform_3, window_bounds = array<i64: 32, 32>}, {pipeline_mode = #tpu.pipeline_mode<synchronous>, transform_indices = @transform_4, window_bounds = array<i64: 1, 32>}, {pipeline_mode = #tpu.pipeline_mode<synchronous>, transform_indices = @transform_5, window_bounds = array<i64: 32, 32>}, {pipeline_mode = #tpu.pipeline_mode<synchronous>, transform_indices = @transform_6, window_bounds = array<i64: 1, 32>}, {pipeline_mode = #tpu.pipeline_mode<synchronous>, transform_indices = @transform_7, window_bounds = array<i64: 32, 16>}, {pipeline_mode = #tpu.pipeline_mode<synchronous>, transform_indices = @transform_8, window_bounds = array<i64: 1, 16>}, {transform_indices = @transform_9, window_bounds = array<i64: 8, 8>}, {transform_indices = @transform_10, window_bounds = array<i64: 8, 24>}]} {
    %c0 = arith.constant 0 : index
    %c0_0 = arith.constant 0 : index
    %0 = vector.load %arg1[%c0, %c0_0] : memref<8x16xf32, #tpu.memory_space<vmem>>, vector<8x16xf32>
    %1 = arith.truncf %0 : vector<8x16xf32> to vector<8x16xbf16>
    %c0_1 = arith.constant 0 : index
    %c0_2 = arith.constant 0 : index
    %2 = vector.load %arg2[%c0_1, %c0_2] : memref<16x32xbf16, #tpu.memory_space<vmem>>, vector<16x32xbf16>
    %cst = arith.constant dense<0.000000e+00> : vector<8x32xf32>
    %3 = tpu.matmul %1, %2, %cst {dimension_numbers = #tpu.dot_dimension_numbers<[1], [0], [0], [1], [0, 0, 1, 1], [], []>} : vector<8x16xbf16>, vector<16x32xbf16>, vector<8x32xf32> -> vector<8x32xf32>
    %c0_3 = arith.constant 0 : index
    %c0_4 = arith.constant 0 : index
    %4 = vector.load %arg3[%c0_3, %c0_4] : memref<1x32xf32, #tpu.memory_space<vmem>>, vector<1x32xf32>
    %5 = vector.broadcast %4 : vector<1x32xf32> to vector<8x32xf32>
    %6 = arith.addf %3, %5 : vector<8x32xf32>
    %cst_5 = arith.constant 0.000000e+00 : f32
    %7 = vector.broadcast %cst_5 : f32 to vector<8x32xf32>
    %8 = arith.maximumf %6, %7 : vector<8x32xf32>
    %9 = arith.truncf %8 : vector<8x32xf32> to vector<8x32xbf16>
    %c0_6 = arith.constant 0 : index
    %c0_7 = arith.constant 0 : index
    %10 = vector.load %arg4[%c0_6, %c0_7] : memref<32x32xbf16, #tpu.memory_space<vmem>>, vector<32x32xbf16>
    %cst_8 = arith.constant dense<0.000000e+00> : vector<8x32xf32>
    %11 = tpu.matmul %9, %10, %cst_8 {dimension_numbers = #tpu.dot_dimension_numbers<[1], [0], [0], [1], [0, 0, 1, 1], [], []>} : vector<8x32xbf16>, vector<32x32xbf16>, vector<8x32xf32> -> vector<8x32xf32>
    %c0_9 = arith.constant 0 : index
    %c0_10 = arith.constant 0 : index
    %12 = vector.load %arg5[%c0_9, %c0_10] : memref<1x32xf32, #tpu.memory_space<vmem>>, vector<1x32xf32>
    %13 = vector.broadcast %12 : vector<1x32xf32> to vector<8x32xf32>
    %14 = arith.addf %11, %13 : vector<8x32xf32>
    %cst_11 = arith.constant 0.000000e+00 : f32
    %15 = vector.broadcast %cst_11 : f32 to vector<8x32xf32>
    %16 = arith.maximumf %14, %15 : vector<8x32xf32>
    %17 = arith.truncf %16 : vector<8x32xf32> to vector<8x32xbf16>
    %c0_12 = arith.constant 0 : index
    %c0_13 = arith.constant 0 : index
    %18 = vector.load %arg6[%c0_12, %c0_13] : memref<32x32xbf16, #tpu.memory_space<vmem>>, vector<32x32xbf16>
    %cst_14 = arith.constant dense<0.000000e+00> : vector<8x32xf32>
    %19 = tpu.matmul %17, %18, %cst_14 {dimension_numbers = #tpu.dot_dimension_numbers<[1], [0], [0], [1], [0, 0, 1, 1], [], []>} : vector<8x32xbf16>, vector<32x32xbf16>, vector<8x32xf32> -> vector<8x32xf32>
    %c0_15 = arith.constant 0 : index
    %c0_16 = arith.constant 0 : index
    %20 = vector.load %arg7[%c0_15, %c0_16] : memref<1x32xf32, #tpu.memory_space<vmem>>, vector<1x32xf32>
    %21 = vector.broadcast %20 : vector<1x32xf32> to vector<8x32xf32>
    %22 = arith.addf %19, %21 : vector<8x32xf32>
    %cst_17 = arith.constant 0.000000e+00 : f32
    %23 = vector.broadcast %cst_17 : f32 to vector<8x32xf32>
    %24 = arith.maximumf %22, %23 : vector<8x32xf32>
    %25 = arith.truncf %24 : vector<8x32xf32> to vector<8x32xbf16>
    %c0_18 = arith.constant 0 : index
    %c0_19 = arith.constant 0 : index
    %26 = vector.load %arg8[%c0_18, %c0_19] : memref<32x16xbf16, #tpu.memory_space<vmem>>, vector<32x16xbf16>
    %cst_20 = arith.constant dense<0.000000e+00> : vector<8x16xf32>
    %27 = tpu.matmul %25, %26, %cst_20 {dimension_numbers = #tpu.dot_dimension_numbers<[1], [0], [0], [1], [0, 0, 1, 1], [], []>} : vector<8x32xbf16>, vector<32x16xbf16>, vector<8x16xf32> -> vector<8x16xf32>
    %c0_21 = arith.constant 0 : index
    %c0_22 = arith.constant 0 : index
    %28 = vector.load %arg9[%c0_21, %c0_22] : memref<1x16xf32, #tpu.memory_space<vmem>>, vector<1x16xf32>
    %29 = vector.broadcast %28 : vector<1x16xf32> to vector<8x16xf32>
    %30 = arith.addf %27, %29 : vector<8x16xf32>
    %31 = vector.extract_strided_slice %30 {offsets = [0, 0], sizes = [8, 8], strides = [1, 1]} : vector<8x16xf32> to vector<8x8xf32>
    %32 = vector.extract_strided_slice %30 {offsets = [0, 8], sizes = [8, 8], strides = [1, 1]} : vector<8x16xf32> to vector<8x8xf32>
    %33 = math.exp %32 : vector<8x8xf32>
    %c0_23 = arith.constant 0 : index
    %c0_24 = arith.constant 0 : index
    %34 = vector.load %arg10[%c0_23, %c0_24] : memref<8x8xf32, #tpu.memory_space<vmem>>, vector<8x8xf32>
    %35 = arith.mulf %33, %34 : vector<8x8xf32>
    %36 = arith.addf %31, %35 : vector<8x8xf32>
    %37 = math.tanh %36 : vector<8x8xf32>
    %38 = tpu.concatenate %37, %31, %33 in 1 : vector<8x8xf32>, vector<8x8xf32>, vector<8x8xf32> -> vector<8x24xf32>
    %c0_25 = arith.constant 0 : index
    %c0_26 = arith.constant 0 : index
    %39 = vector.load %arg11[%c0_25, %c0_26] : memref<8x24xf32, #tpu.memory_space<vmem>>, vector<8x24xf32>
    tpu.vector_store %arg11[%c0_25, %c0_26], %38 {strides = array<i32>} : memref<8x24xf32, #tpu.memory_space<vmem>>, vector<8x24xf32>,
    return
  }
  func.func @transform_0(%arg0: i32) -> (i32, i32) {
    %c0_i32 = arith.constant 0 : i32
    %c0_i32_0 = arith.constant 0 : i32
    return %arg0, %c0_i32 : i32, i32
  }
  func.func @transform_1(%arg0: i32) -> (i32, i32) {
    %c0_i32 = arith.constant 0 : i32
    %c0_i32_0 = arith.constant 0 : i32
    %c0_i32_1 = arith.constant 0 : i32
    return %c0_i32, %c0_i32_0 : i32, i32
  }
  func.func @transform_2(%arg0: i32) -> (i32, i32) {
    %c0_i32 = arith.constant 0 : i32
    %c0_i32_0 = arith.constant 0 : i32
    %c0_i32_1 = arith.constant 0 : i32
    return %c0_i32, %c0_i32_0 : i32, i32
  }
  func.func @transform_3(%arg0: i32) -> (i32, i32) {
    %c0_i32 = arith.constant 0 : i32
    %c0_i32_0 = arith.constant 0 : i32
    %c0_i32_1 = arith.constant 0 : i32
    return %c0_i32, %c0_i32_0 : i32, i32
  }
  func.func @transform_4(%arg0: i32) -> (i32, i32) {
    %c0_i32 = arith.constant 0 : i32
    %c0_i32_0 = arith.constant 0 : i32
    %c0_i32_1 = arith.constant 0 : i32
    return %c0_i32, %c0_i32_0 : i32, i32
  }
  func.func @transform_5(%arg0: i32) -> (i32, i32) {
    %c0_i32 = arith.constant 0 : i32
    %c0_i32_0 = arith.constant 0 : i32
    %c0_i32_1 = arith.constant 0 : i32
    return %c0_i32, %c0_i32_0 : i32, i32
  }
  func.func @transform_6(%arg0: i32) -> (i32, i32) {
    %c0_i32 = arith.constant 0 : i32
    %c0_i32_0 = arith.constant 0 : i32
    %c0_i32_1 = arith.constant 0 : i32
    return %c0_i32, %c0_i32_0 : i32, i32
  }
  func.func @transform_7(%arg0: i32) -> (i32, i32) {
    %c0_i32 = arith.constant 0 : i32
    %c0_i32_0 = arith.constant 0 : i32
    %c0_i32_1 = arith.constant 0 : i32
    return %c0_i32, %c0_i32_0 : i32, i32
  }
  func.func @transform_8(%arg0: i32) -> (i32, i32) {
    %c0_i32 = arith.constant 0 : i32
    %c0_i32_0 = arith.constant 0 : i32
    %c0_i32_1 = arith.constant 0 : i32
    return %c0_i32, %c0_i32_0 : i32, i32
  }
  func.func @transform_9(%arg0: i32) -> (i32, i32) {
    %c0_i32 = arith.constant 0 : i32
    %c0_i32_0 = arith.constant 0 : i32
    return %arg0, %c0_i32 : i32, i32
  }
  func.func @transform_10(%arg0: i32) -> (i32, i32) {
    %c0_i32 = arith.constant 0 : i32
    %c0_i32_0 = arith.constant 0 : i32
    return %arg0, %c0_i32 : i32, i32
  }
}

</mosaic_0001>

<bundles_post_ra>
// kernel: mpo_actor_forward.1
= control target key start
LH: loop header
LB: loop body
LE: loop exit
PB: predicated region body
PF: predicated region fallthrough
CT: control target
= control target key end

     0   :  { %15 = vsyncpa [#allocation3], 0  ;;  %s621_s0 = inlined_call_operand.vmem [shape: f32[8,16], index: 0, kind: input, shape index: {}]   ;;  %s622_s1 = inlined_call_operand.hbm [shape: bf16[16,32], index: 1, kind: input, shape index: {}]   ;;  %s623_s2 = inlined_call_operand.hbm [shape: f32[1,32], index: 2, kind: input, shape index: {}]   ;;  %s624_s3 = inlined_call_operand.vmem [shape: bf16[32,32], index: 3, kind: input, shape index: {}]   ;;  %s625_s4 = inlined_call_operand.hbm [shape: f32[1,32], index: 4, kind: input, shape index: {}]   ;;  %s626_s5 = inlined_call_operand.hbm [shape: bf16[32,32], index: 5, kind: input, shape index: {}]   ;;  %s627_s6 = inlined_call_operand.hbm [shape: f32[1,32], index: 6, kind: input, shape index: {}]   ;;  %s628_s7 = inlined_call_operand.vmem [shape: bf16[32,16], index: 7, kind: input, shape index: {}]   ;;  %s629_s8 = inlined_call_operand.hbm [shape: f32[1,16], index: 8, kind: input, shape index: {}]   ;;  %s630_s9 = inlined_call_operand.vmem [shape: f32[8,8], index: 9, kind: input, shape index: {}]   ;;  %s631_s10 = inlined_call_operand.vmem [shape: f32[8,24], index: 10, kind: output, shape index: {}]  }
   0x1   :  { %16 = vsyncpa [#allocation5], 0 }
   0x2   :  { %17 = vsyncpa [#allocation8], 0  ;;  %s39_s15 = sshll.u32 %s623_s2, 4  ;;  %s40_s15 = int_to_ptr.hbm [resolvable:$true] %s39_s15 }
   0x3   :  { %18 = vsyncpa [#allocation11], 0  ;;  %s512_s16 = smov [#allocation4]   ;;  %s62_s20 = sshll.u32 %s626_s5, 4  ;;  %s63_s20 = int_to_ptr.hbm [resolvable:$true] %s62_s20 }
   0x4   :  { %s41_s17 = sshll.u32 %s512_s16, 4  ;;  %s513_s21 = smov [#allocation7]   ;;  %s42_s17 = int_to_ptr.vmem [resolvable:$true] %s41_s17 }
   0x5   :  { %44 = dma.hbm_to_vmem [thread:$0]  %s40_s15, 16, %s42_s17, [#allocation5]  }
   0x6   :  { %s64_s22 = sshll.u32 %s513_s21, 4  ;;  %s25_s25 = sshll.u32 %s622_s1, 4  ;;  %s65_s22 = int_to_ptr.vmem [resolvable:$true] %s64_s22  ;;  %s26_s25 = int_to_ptr.hbm [resolvable:$true] %s25_s25 }
   0x7   :  { %s514_s2 = smov 64   ;;  %s515_s26 = smov 4  }
   0x8   :  { %70 = dma.hbm_to_vmem [thread:$0]  %s63_s20, 256, %s65_s22, [#allocation8], %s514_s2, %s514_s2, %s515_s26  }
   0x9   :  { %s52_s29 = sshll.u32 %s625_s4, 4  ;;  %s516_s30 = smov [#allocation2]   ;;  %s53_s29 = int_to_ptr.hbm [resolvable:$true] %s52_s29 }
   0xa   :  { %s27_s11 = sshll.u32 %s516_s30, 4  ;;  %s517_s5 = smov [#allocation6]   ;;  %s28_s11 = int_to_ptr.vmem [resolvable:$true] %s27_s11 }
   0xb   :  { %33 = dma.hbm_to_vmem [thread:$0]  %s26_s25, 128, %s28_s11, [#allocation3], %s514_s2, %s514_s2, %s515_s26  }
   0xc   :  { %s54_s12 = sshll.u32 %s517_s5, 4  ;;  %s76_s1 = sshll.u32 %s627_s6, 4  ;;  %s55_s12 = int_to_ptr.vmem [resolvable:$true] %s54_s12  ;;  %s77_s1 = int_to_ptr.hbm [resolvable:$true] %s76_s1 }
   0xd   :  { %57 = dma.hbm_to_vmem [thread:$0]  %s53_s29, 16, %s55_s12, [#allocation5]  }
   0xe   :  { %s89_s17 = sshll.u32 %s629_s8, 4  ;;  %s518_s18 = smov [#allocation9]   ;;  %s90_s17 = int_to_ptr.hbm [resolvable:$true] %s89_s17 }
   0xf   :  { %s78_s4 = sshll.u32 %s518_s18, 4  ;;  %s519_s19 = smov [#allocation10]   ;;  %s79_s4 = int_to_ptr.vmem [resolvable:$true] %s78_s4 }
  0x10   :  { %81 = dma.hbm_to_vmem [thread:$0]  %s77_s1, 16, %s79_s4, [#allocation8]  }
  0x11   :  { %s91_s20 = sshll.u32 %s519_s19, 4  ;;  %s92_s20 = int_to_ptr.vmem [resolvable:$true] %s91_s20 }
  0x12   :  { %94 = dma.hbm_to_vmem [thread:$0]  %s90_s17, 16, %s92_s20, [#allocation11]  }
  0x13   :  { %504 = dma.done.wait [#allocation3], 128  }
  0x14   :  { %505 = vsyncadd [#allocation3], 4294967168 }
  0x15   :  { %506 = dma.done.wait [#allocation5], 32  }
  0x16   :  { %507 = vsyncadd [#allocation5], 4294967264 }
  0x17   :  { %508 = dma.done.wait [#allocation8], 272  }
  0x18   :  { %509 = vsyncadd [#allocation8], 4294967024 }
  0x19   :  { %510 = dma.done.wait [#allocation11], 16  }
  0x1a   :  { %511 = vsyncadd [#allocation11], 4294967280  ;;  %v335_v0 = vld [vmem:[#allocation2] sm:$0xff]  ;;  %vm136_vm0 = vcmask 130048   ;;  %v337_v3 = vld [vmem:[%s624_s3 + $0x8] sm:$0xff]  ;;  %vm175_vm1 = vcmask 261120  }
  0x1b   :  { %v122_v1 = vld [vmem:[%s621_s0] sm:$0xff]  ;;  %147 = vmatpush.bf16.msra.mxu0 %v335_v0  ;;  %185 = vmatpush.bf16.msra.mxu1 %v337_v3  ;;  %v352_v5 = vld [vmem:[#allocation4] ss:$0 sm:$0xff]  ;;  %v339_v11 = vld [vmem:[#allocation7 + $0x8] sm:$0xff]  ;;  %s520_s28 = smov 8   ;;  %vm290_vm2 = vcmask 64512  }
  0x1c   :  { %v123_v2 = vpack.c.bf16 %v122_v1, %v122_v1  ;;  %v336_v4 = vld [vmem:[%s624_s3] sm:$0xff]  ;;  %223 = vmatpush.bf16.msra.mxu2 %v339_v11  ;;  %v338_v12 = vld [vmem:[#allocation7] sm:$0xff]  ;;  %v353_v13 = vld [vmem:[#allocation6] ss:$0 sm:$0xff]  ;;  %vm293_vm3 = vcmask 195584  }
  0x1d   :  { %v341_v19 = vld [vmem:[%s628_s7 + $0x8] sm:$0xff]  ;;  %v340_v20 = vld [vmem:[%s628_s7] sm:$0xff]  ;;  %v354_v22 = vld [vmem:[#allocation9] ss:$0 sm:$0xff]  ;;  %s521_s7 = smov 120  }
  0x1e   :  { %307 = vmatmul.msk.bf16.vlgmr.msra.gmra.mxu0 %vm136_vm0, %v123_v2  ;;  %261 = vmatpush.bf16.msra.mxu3 %v341_v19  ;;  %v270_v21 = vld [vmem:[%s630_s9] sm:$0xff]  ;;  %v355_v28 = vld [vmem:[#allocation10] ss:$0 sm:$0xff] }
  0x1f   :  { %186 = vmatpush.bf16.msra.mxu1 %v336_v4  ;;  %272 = vrot.lane.b32.xlu0 %v270_v21, %s520_s28 }
  0x20   :  { %224 = vmatpush.bf16.msra.mxu2 %v338_v12 }
  0x22   :  { %262 = vmatpush.bf16.msra.mxu3 %v340_v20 }
  0x91   :  { %v273_v33 = vpop.permute.xlu0 %272 }
  0x9b   :  { %v149_v6 = vpop.f32.mrf.mxu0 }
  0x9c   :  { %v150_v7 = vadd.f32 %v352_v5, %v149_v6 }
  0x9e   :  { %v153_v8 = vmax.f32 %v150_v7, 0.0 }
  0xa0   :  { %v154_v9 = vpack.c.bf16 %v153_v8, %v153_v8 }
  0xa2   :  { %316 = vmatmul.msk.bf16.vlgmr.msra.gmra.mxu1 %vm175_vm1, %v154_v9 }
  0xa3   :  { %v151_v10 = vpop.f32.mrf.mxu0 }
 0x11f   :  { %v188_v14 = vpop.f32.mrf.mxu1 }
 0x120   :  { %v189_v15 = vadd.f32 %v353_v13, %v188_v14 }
 0x122   :  { %v192_v16 = vmax.f32 %v189_v15, 0.0 }
 0x124   :  { %v193_v17 = vpack.c.bf16 %v192_v16, %v192_v16 }
 0x126   :  { %325 = vmatmul.msk.bf16.vlgmr.msra.gmra.mxu2 %vm175_vm1, %v193_v17 }
 0x127   :  { %v190_v18 = vpop.f32.mrf.mxu1 }
 0x1a9   :  { %v226_v23 = vpop.f32.mrf.mxu2 }
 0x1aa   :  { %v227_v24 = vadd.f32 %v354_v22, %v226_v23 }
 0x1ac   :  { %v230_v25 = vmax.f32 %v227_v24, 0.0 }
 0x1ae   :  { %v231_v26 = vpack.c.bf16 %v230_v25, %v230_v25 }
 0x1b0   :  { %334 = vmatmul.msk.bf16.vlgmr.msra.gmra.mxu3 %vm175_vm1, %v231_v26 }
 0x1b1   :  { %v228_v27 = vpop.f32.mrf.mxu2 }
 0x233   :  { %v264_v29 = vpop.f32.mrf.mxu3 }
 0x234   :  { %v265_v30 = vadd.f32 %v355_v28, %v264_v29 }
 0x236   :  { %v268_v31 = vmul.f32 1.442695, %v265_v30  ;;  %283 = vrot.lane.b32.xlu1 %v265_v30, %s520_s28 }
 0x238   :  { %356 = vpow2.f32 %v268_v31 }
 0x23b   :  { %v266_v32 = vpop.f32.mrf.mxu3 }
 0x23e   :  { %v357_v34 = vpop.eup %356 }
 0x23f   :  { %v275_v35 = vmul.f32 %v357_v34, %v273_v33  ;;  %287 = vrot.lane.b32.xlu1 %v357_v34, %s520_s28 }
 0x241   :  { %277 = vrot.lane.b32.xlu0 %v275_v35, %s521_s7 }
 0x2a8   :  { %v284_v36 = vpop.permute.xlu1 %283 }
 0x2b1   :  { %v288_v40 = vpop.permute.xlu1 %287 }
 0x2b3   :  { %v278_v37 = vpop.permute.xlu0 %277 }
 0x2b4   :  { %v280_v38 = vadd.f32 %v278_v37, %v265_v30 }
 0x2b6   :  { %358 = vtanh.f32 %v280_v38 }
 0x2bc   :  { %v359_v39 = vpop.eup %358 }
 0x2bd   :  { %v291_v41 = vsel %vm290_vm2, %v359_v39, %v284_v36 }
 0x2be   :  { %v292_v42 = vsel %vm136_vm0, %v291_v41, %v288_v40 }
 0x2bf   :  { %294 = vst.msk [vmem:[%s631_s10] sm:$0xff] %vm293_vm3, %v292_v42 }
 0x2c0   :  { %299 = vsyncpa [#allocation3], 1 }
 0x2c1   :  { %300 = vsyncpa [#allocation5], 1 }
 0x2c2   :  { %301 = vsyncpa [#allocation8], 1 }
 0x2c3   :  { %302 = vsyncpa [#allocation11], 1 }

</bundles_post_ra>
